<compile_context>
chip_gen: v7x
topology: tpu7x:2x2x1
jax: 0.10.0
libtpu: 0.0.40
codegen_flags: <defaults>
</compile_context>

<pallas_src>
import functools

import jax
import jax.numpy as jnp
from jax.experimental import pallas as pl
from jax.experimental.pallas import tpu as pltpu

EPS = 1e-6


def _minkpool_kernel(x_ref, w1_ref, b1_ref, w2_ref, b2_ref, avg_ref, out_ref, *, p):
    # x_ref: (TB*N, Cin) — TB clouds' points stacked on the sublane/M axis.
    x = x_ref[...]

    # Per-point MLP (== stacked 1x1 sparse convs); both dots on the MXU, f32 accumulate.
    h = jnp.dot(x, w1_ref[...], preferred_element_type=jnp.float32) + b1_ref[...]
    h = jnp.maximum(h, 0.0)                                              # ReLU
    f = jnp.dot(h.astype(w2_ref.dtype), w2_ref[...],
                preferred_element_type=jnp.float32) + b2_ref[...]        # (TB*N, FP)

    # GeM pooling.
    c = jnp.maximum(f, EPS)
    if float(p).is_integer() and 1 <= int(p) <= 8:
        # Static integer p (p=3.0 at inference): pure VPU multiplies, no EUP exp/log
        # over the full (TB*N, FP) tile.
        fp = c
        for _ in range(int(p) - 1):
            fp = fp * c
    else:
        # Runtime / fractional p fallback (EUP transcendentals).
        fp = jnp.power(c, p)

    # Per-cloud mean over the N points as a block-diagonal (1/N) averaging matmul on
    # the otherwise-idle MXU (avoids a cross-sublane VPU/XLU reduction).
    m = jnp.dot(avg_ref[...], fp, preferred_element_type=jnp.float32)    # (TB, FP)

    # ^(1/p) only on the tiny pooled tile; lane-dense unmasked store.
    out_ref[...] = jnp.power(m, 1.0 / p)


def prepare_params(w1, b1, w2, b2, *, lane=128, dtype=jnp.float32):
    """One-time parameter preparation (parameter init, NOT per forward call):
    pad the final feature dim to a full 128-lane width, reshape biases to 2-D,
    optionally cast matmul weights to bf16 for the MXU."""
    Cin, H = w1.shape
    F = w2.shape[1]
    FP = max(lane, ((F + lane - 1) // lane) * lane)
    w2p = jnp.zeros((H, FP), jnp.float32).at[:, :F].set(w2)
    b2p = jnp.zeros((1, FP), jnp.float32).at[0, :F].set(b2)
    return {
        "w1": w1.astype(dtype),
        "b1": b1.reshape(1, H).astype(jnp.float32),
        "w2": w2p.astype(dtype),
        "b2": b2p,
    }


def minkpool_forward(x, w1, b1_2d, w2p, b2p, *, p, feature_size, tb=None,
                     use_bf16=False):
    """x: [B, N, Cin] float32. Returns g_fea: [B, feature_size] float32.

    tb = clouds per grid step (default: all B in one fat step). For production B on
    v7x, pick tb so B//tb is even (>=2) to balance the two TensorCores, tb a multiple
    of 8 for the output block, and size tb*N*FP*4 B of intermediates against v7x's
    64 MiB / v5e's 16 MiB default-scoped VMEM.
    """
    B, N, Cin = x.shape
    H = w1.shape[1]
    FP = w2p.shape[1]
    tb = B if tb is None else tb
    assert B % tb == 0, "tb must divide B"
    num_blocks = B // tb
    M = tb * N

    # Free reshape (no transpose, no extra HBM pass): stack all points on the M axis.
    x2d = x.reshape(B * N, Cin)
    if use_bf16:
        x2d = x2d.astype(jnp.bfloat16)   # pair with prepare_params(dtype=jnp.bfloat16)

    # Block-diagonal per-cloud averaging matrix (constant-folded under jit).
    avg = jnp.kron(jnp.eye(tb, dtype=jnp.float32),
                   jnp.full((1, N), 1.0 / N, jnp.float32))               # (tb, tb*N)

    out = pl.pallas_call(
        functools.partial(_minkpool_kernel, p=float(p)),
        out_shape=jax.ShapeDtypeStruct((B, FP), jnp.float32),
        grid_spec=pltpu.PrefetchScalarGridSpec(
            num_scalar_prefetch=0,
            grid=(num_blocks,),
            in_specs=[
                pl.BlockSpec((M, Cin), lambda i: (i, 0)),   # tb clouds' points per step
                pl.BlockSpec((Cin, H), lambda i: (0, 0)),   # w1 (full, constant index)
                pl.BlockSpec((1, H), lambda i: (0, 0)),     # b1
                pl.BlockSpec((H, FP), lambda i: (0, 0)),    # w2 (lane-padded)
                pl.BlockSpec((1, FP), lambda i: (0, 0)),    # b2 (lane-padded)
                pl.BlockSpec((tb, M), lambda i: (0, 0)),    # per-cloud averaging matrix
            ],
            out_specs=pl.BlockSpec((tb, FP), lambda i: (i, 0)),
        ),
        compiler_params=pltpu.CompilerParams(
            dimension_semantics=("parallel",)),
    )(x2d, w1, b1_2d, w2p, b2p, avg)
    return out[:, :feature_size]


def minkpool_reference(x, w1, b1, w2, b2, p):
    h = jnp.maximum(jnp.einsum("bnc,ch->bnh", x, w1) + b1, 0.0)
    f = jnp.einsum("bnh,hf->bnf", h, w2) + b2
    fp = jnp.power(jnp.maximum(f, EPS), p)
    return jnp.power(jnp.mean(fp, axis=1), 1.0 / p)


if __name__ == "__main__":
    # Small shapes consistent with the module: batch=2, in_channels=8,
    # points-per-cloud=128, hidden=32, feature_size = output_dim = 32.
    B, N, Cin, H, F = 2, 128, 8, 32, 32

    key = jax.random.PRNGKey(0)
    k_x, k_w1, k_b1, k_w2, k_b2 = jax.random.split(key, 5)

    x = jax.random.normal(k_x, (B, N, Cin), dtype=jnp.float32)
    w1 = jax.random.normal(k_w1, (Cin, H), dtype=jnp.float32) * 0.1
    b1 = jax.random.normal(k_b1, (H,), dtype=jnp.float32) * 0.01
    w2 = jax.random.normal(k_w2, (H, F), dtype=jnp.float32) * 0.1
    b2 = jax.random.normal(k_b2, (F,), dtype=jnp.float32) * 0.01
    p = 3.0  # GeM power parameter (nn.Parameter init value in pooling.GeM)

    params = prepare_params(w1, b1, w2, b2)          # one-time pad/reshape (init-time)
    fwd = jax.jit(minkpool_forward,
                  static_argnames=("p", "feature_size", "tb", "use_bf16"))

    g_fea = fwd(x, params["w1"], params["b1"], params["w2"], params["b2"],
                p=p, feature_size=F)
    g_fea = jax.block_until_ready(g_fea)

    ref = minkpool_reference(x, w1, b1, w2, b2, p)
    assert g_fea.shape == (B, F), g_fea.shape
    assert jnp.allclose(g_fea, ref, atol=1e-4, rtol=1e-4), "mismatch vs reference"

    print("KERNEL_OK")
</pallas_src>

<mosaic_0001>
module attributes {stable_mosaic.version = 11 : i64} {
  func.func @_minkpool_kernel(%arg0: i32, %arg1: memref<256x8xf32, #tpu.memory_space<vmem>>, %arg2: memref<8x32xf32, #tpu.memory_space<vmem>>, %arg3: memref<1x32xf32, #tpu.memory_space<vmem>>, %arg4: memref<32x128xf32, #tpu.memory_space<vmem>>, %arg5: memref<1x128xf32, #tpu.memory_space<vmem>>, %arg6: memref<2x256xf32, #tpu.memory_space<vmem>>, %arg7: memref<2x128xf32, #tpu.memory_space<vmem>>) attributes {dimension_semantics = [#tpu.dimension_semantics<parallel>], iteration_bounds = array<i64: 1>, scalar_prefetch = 0 : i64, scratch_operands = 0 : i64, tpu.core_type = #tpu.core_type<tc>, window_params = [{transform_indices = @transform_0, window_bounds = array<i64: 256, 8>}, {pipeline_mode = #tpu.pipeline_mode<synchronous>, transform_indices = @transform_1, window_bounds = array<i64: 8, 32>}, {pipeline_mode = #tpu.pipeline_mode<synchronous>, transform_indices = @transform_2, window_bounds = array<i64: 1, 32>}, {pipeline_mode = #tpu.pipeline_mode<synchronous>, transform_indices = @transform_3, window_bounds = array<i64: 32, 128>}, {pipeline_mode = #tpu.pipeline_mode<synchronous>, transform_indices = @transform_4, window_bounds = array<i64: 1, 128>}, {pipeline_mode = #tpu.pipeline_mode<synchronous>, transform_indices = @transform_5, window_bounds = array<i64: 2, 256>}, {transform_indices = @transform_6, window_bounds = array<i64: 2, 128>}]} {
    %c0 = arith.constant 0 : index
    %c0_0 = arith.constant 0 : index
    %0 = vector.load %arg1[%c0, %c0_0] : memref<256x8xf32, #tpu.memory_space<vmem>>, vector<256x8xf32>
    %c0_1 = arith.constant 0 : index
    %c0_2 = arith.constant 0 : index
    %1 = vector.load %arg2[%c0_1, %c0_2] : memref<8x32xf32, #tpu.memory_space<vmem>>, vector<8x32xf32>
    %cst = arith.constant dense<0.000000e+00> : vector<256x32xf32>
    %2 = tpu.matmul %0, %1, %cst {dimension_numbers = #tpu.dot_dimension_numbers<[1], [0], [0], [1], [0, 0, 1, 1], [], []>} : vector<256x8xf32>, vector<8x32xf32>, vector<256x32xf32> -> vector<256x32xf32>
    %c0_3 = arith.constant 0 : index
    %c0_4 = arith.constant 0 : index
    %3 = vector.load %arg3[%c0_3, %c0_4] : memref<1x32xf32, #tpu.memory_space<vmem>>, vector<1x32xf32>
    %4 = vector.broadcast %3 : vector<1x32xf32> to vector<256x32xf32>
    %5 = arith.addf %2, %4 : vector<256x32xf32>
    %cst_5 = arith.constant 0.000000e+00 : f32
    %6 = vector.broadcast %cst_5 : f32 to vector<256x32xf32>
    %7 = arith.maximumf %5, %6 : vector<256x32xf32>
    %c0_6 = arith.constant 0 : index
    %c0_7 = arith.constant 0 : index
    %8 = vector.load %arg4[%c0_6, %c0_7] : memref<32x128xf32, #tpu.memory_space<vmem>>, vector<32x128xf32>
    %cst_8 = arith.constant dense<0.000000e+00> : vector<256x128xf32>
    %9 = tpu.matmul %7, %8, %cst_8 {dimension_numbers = #tpu.dot_dimension_numbers<[1], [0], [0], [1], [0, 0, 1, 1], [], []>} : vector<256x32xf32>, vector<32x128xf32>, vector<256x128xf32> -> vector<256x128xf32>
    %c0_9 = arith.constant 0 : index
    %c0_10 = arith.constant 0 : index
    %10 = vector.load %arg5[%c0_9, %c0_10] : memref<1x128xf32, #tpu.memory_space<vmem>>, vector<1x128xf32>
    %11 = vector.broadcast %10 : vector<1x128xf32> to vector<256x128xf32>
    %12 = arith.addf %9, %11 : vector<256x128xf32>
    %cst_11 = arith.constant 9.99999997E-7 : f32
    %13 = vector.broadcast %cst_11 : f32 to vector<256x128xf32>
    %14 = arith.maximumf %12, %13 : vector<256x128xf32>
    %15 = arith.mulf %14, %14 : vector<256x128xf32>
    %16 = arith.mulf %15, %14 : vector<256x128xf32>
    %c0_12 = arith.constant 0 : index
    %c0_13 = arith.constant 0 : index
    %17 = vector.load %arg6[%c0_12, %c0_13] : memref<2x256xf32, #tpu.memory_space<vmem>>, vector<2x256xf32>
    %cst_14 = arith.constant dense<0.000000e+00> : vector<2x128xf32>
    %18 = tpu.matmul %17, %16, %cst_14 {dimension_numbers = #tpu.dot_dimension_numbers<[1], [0], [0], [1], [0, 0, 1, 1], [], []>} : vector<2x256xf32>, vector<256x128xf32>, vector<2x128xf32> -> vector<2x128xf32>
    %cst_15 = arith.constant 0.333333343 : f32
    %19 = vector.broadcast %cst_15 : f32 to vector<2x128xf32>
    %20 = math.powf %18, %19 : vector<2x128xf32>
    %c0_16 = arith.constant 0 : index
    %c0_17 = arith.constant 0 : index
    %21 = vector.load %arg7[%c0_16, %c0_17] : memref<2x128xf32, #tpu.memory_space<vmem>>, vector<2x128xf32>
    tpu.vector_store %arg7[%c0_16, %c0_17], %20 {strides = array<i32>} : memref<2x128xf32, #tpu.memory_space<vmem>>, vector<2x128xf32>,
    return
  }
  func.func @transform_0(%arg0: i32) -> (i32, i32) {
    %c0_i32 = arith.constant 0 : i32
    %c0_i32_0 = arith.constant 0 : i32
    return %arg0, %c0_i32 : i32, i32
  }
  func.func @transform_1(%arg0: i32) -> (i32, i32) {
    %c0_i32 = arith.constant 0 : i32
    %c0_i32_0 = arith.constant 0 : i32
    %c0_i32_1 = arith.constant 0 : i32
    return %c0_i32, %c0_i32_0 : i32, i32
  }
  func.func @transform_2(%arg0: i32) -> (i32, i32) {
    %c0_i32 = arith.constant 0 : i32
    %c0_i32_0 = arith.constant 0 : i32
    %c0_i32_1 = arith.constant 0 : i32
    return %c0_i32, %c0_i32_0 : i32, i32
  }
  func.func @transform_3(%arg0: i32) -> (i32, i32) {
    %c0_i32 = arith.constant 0 : i32
    %c0_i32_0 = arith.constant 0 : i32
    %c0_i32_1 = arith.constant 0 : i32
    return %c0_i32, %c0_i32_0 : i32, i32
  }
  func.func @transform_4(%arg0: i32) -> (i32, i32) {
    %c0_i32 = arith.constant 0 : i32
    %c0_i32_0 = arith.constant 0 : i32
    %c0_i32_1 = arith.constant 0 : i32
    return %c0_i32, %c0_i32_0 : i32, i32
  }
  func.func @transform_5(%arg0: i32) -> (i32, i32) {
    %c0_i32 = arith.constant 0 : i32
    %c0_i32_0 = arith.constant 0 : i32
    %c0_i32_1 = arith.constant 0 : i32
    return %c0_i32, %c0_i32_0 : i32, i32
  }
  func.func @transform_6(%arg0: i32) -> (i32, i32) {
    %c0_i32 = arith.constant 0 : i32
    %c0_i32_0 = arith.constant 0 : i32
    return %arg0, %c0_i32 : i32, i32
  }
}

</mosaic_0001>

<bundles_post_ra>
// kernel: minkpool_forward.1
= control target key start
LH: loop header
LB: loop body
LE: loop exit
PB: predicated region body
PF: predicated region fallthrough
CT: control target
= control target key end

     0   :  { %vm64_vm0 = vcmask 64512   ;;  %s1686_s0 = inlined_call_operand.vmem [shape: f32[256,8], index: 0, kind: input, shape index: {}]   ;;  %s1687_s1 = inlined_call_operand.vmem [shape: f32[8,32], index: 1, kind: input, shape index: {}]   ;;  %s1688_s2 = inlined_call_operand.vmem [shape: f32[1,32], index: 2, kind: input, shape index: {}]   ;;  %s1689_s3 = inlined_call_operand.vmem [shape: f32[32,128], index: 3, kind: input, shape index: {}]   ;;  %s1690_s4 = inlined_call_operand.vmem [shape: f32[1,128], index: 4, kind: input, shape index: {}]   ;;  %s1691_s5 = inlined_call_operand.vmem [shape: f32[2,256], index: 5, kind: input, shape index: {}]   ;;  %s1692_s6 = inlined_call_operand.hbm [shape: f32[2,128], index: 6, kind: output, shape index: {}]  }
   0x1   :  { %v56_v0 = vld [vmem:[%s1687_s1] sm:$0xff]  ;;  %v25_v2 = vld [vmem:[%s1686_s0 + $0x8] sm:$0xff]  ;;  %v26_v3 = vld [vmem:[%s1686_s0 + $0x10] sm:$0xff] }
   0x2   :  { %v24_v1 = vld [vmem:[%s1686_s0] sm:$0xff]  ;;  %1116 = vmatprep.subr.mxu0 %v56_v0  ;;  %v27_v4 = vld [vmem:[%s1686_s0 + $0x18] sm:$0xff]  ;;  %v29_v6 = vld [vmem:[%s1686_s0 + $0x28] sm:$0xff] }
   0x3   :  { %1118 = vmatprep.mubr.msk.f32.mxu0 %vm64_vm0, %v24_v1  ;;  %1117 = vmatpush3.msra.mxu0 %v56_v0  ;;  %v28_v5 = vld [vmem:[%s1686_s0 + $0x20] sm:$0xff]  ;;  %v30_v7 = vld [vmem:[%s1686_s0 + $0x30] sm:$0xff]  ;;  %v419_v9 = vld [vmem:[%s1689_s3 + $0x8] sm:$0xff] }
   0x4   :  { %1119 = vmatmul.mubr.msk.f32.vlgmr.msra.gmra.mrb[0].mxu0 %vm64_vm0, %v25_v2  ;;  %v418_v8 = vld [vmem:[%s1689_s3] sm:$0xff] }
   0x5   :  { %1121 = vmatprep.mubr.msk.f32.mxu0 %vm64_vm0, %v26_v3 }
   0x8   :  { %1122 = vmatmul.mubr.msk.f32.gmra.mrb[2].mxu0 %vm64_vm0, %v27_v4 }
   0x9   :  { %1124 = vmatprep.mubr.msk.f32.mxu0 %vm64_vm0, %v28_v5 }
   0xc   :  { %1125 = vmatmul.mubr.msk.f32.gmra.mrb[4].mxu0 %vm64_vm0, %v29_v6 }
   0xd   :  { %11 = vsyncpa [#allocation3], 0  ;;  %1127 = vmatprep.mubr.msk.f32.mxu0 %vm64_vm0, %v30_v7  ;;  %v31_v10 = vld [vmem:[%s1686_s0 + $0x38] sm:$0xff]  ;;  %v1222_v11 = vpack.c.bf16 %v419_v9, %v418_v8  ;;  %v32_v12 = vld [vmem:[%s1686_s0 + $0x40] sm:$0xff]  ;;  %vm429_vm1 = vcmask 261120  }
   0xe   :  { %v33_v13 = vld [vmem:[%s1686_s0 + $0x48] sm:$0xff]  ;;  %v34_v14 = vld [vmem:[%s1686_s0 + $0x50] sm:$0xff]  ;;  %v35_v15 = vld [vmem:[%s1686_s0 + $0x58] sm:$0xff] }
   0xf   :  { %1223 = vmatprep.subr.bf16.mxu1 %v1222_v11  ;;  %v36_v16 = vld [vmem:[%s1686_s0 + $0x60] sm:$0xff]  ;;  %v37_v17 = vld [vmem:[%s1686_s0 + $0x68] sm:$0xff]  ;;  %v38_v18 = vld [vmem:[%s1686_s0 + $0x70] sm:$0xff] }
  0x10   :  { %1128 = vmatmul.mubr.msk.f32.gmra.mrb[6].mxu0 %vm64_vm0, %v31_v10  ;;  %1225 = vmatpush3.bf16.msra.mxu1 %v1222_v11  ;;  %v39_v19 = vld [vmem:[%s1686_s0 + $0x78] sm:$0xff]  ;;  %v40_v20 = vld [vmem:[%s1686_s0 + $0x80] sm:$0xff]  ;;  %v41_v21 = vld [vmem:[%s1686_s0 + $0x88] sm:$0xff] }
  0x11   :  { %1130 = vmatprep.mubr.msk.f32.mxu0 %vm64_vm0, %v32_v12  ;;  %v42_v22 = vld [vmem:[%s1686_s0 + $0x90] sm:$0xff]  ;;  %v43_v23 = vld [vmem:[%s1686_s0 + $0x98] sm:$0xff]  ;;  %v44_v24 = vld [vmem:[%s1686_s0 + $0xa0] sm:$0xff] }
  0x12   :  { %v45_v25 = vld [vmem:[%s1686_s0 + $0xa8] sm:$0xff]  ;;  %v46_v26 = vld [vmem:[%s1686_s0 + $0xb0] sm:$0xff]  ;;  %v47_v27 = vld [vmem:[%s1686_s0 + $0xb8] sm:$0xff] }
  0x13   :  { %v48_v28 = vld [vmem:[%s1686_s0 + $0xc0] sm:$0xff]  ;;  %v49_v29 = vld [vmem:[%s1686_s0 + $0xc8] sm:$0xff]  ;;  %v50_v30 = vld [vmem:[%s1686_s0 + $0xd0] sm:$0xff] }
  0x14   :  { %1131 = vmatmul.mubr.msk.f32.gmra.mrb[8].mxu0 %vm64_vm0, %v33_v13  ;;  %v51_v31 = vld [vmem:[%s1686_s0 + $0xd8] sm:$0xff]  ;;  %v52_v32 = vld [vmem:[%s1686_s0 + $0xe0] sm:$0xff]  ;;  %v53_v33 = vld [vmem:[%s1686_s0 + $0xe8] sm:$0xff] }
  0x15   :  { %1133 = vmatprep.mubr.msk.f32.mxu0 %vm64_vm0, %v34_v14  ;;  %v54_v34 = vld [vmem:[%s1686_s0 + $0xf0] sm:$0xff]  ;;  %v55_v35 = vld [vmem:[%s1686_s0 + $0xf8] sm:$0xff]  ;;  %v1491_v39 = vld [vmem:[%s1688_s2] ss:$0 sm:$0xff] }
  0x16   :  { %v420_v36 = vld [vmem:[%s1689_s3 + $0x10] sm:$0xff]  ;;  %v421_v37 = vld [vmem:[%s1689_s3 + $0x18] sm:$0xff] }
  0x17   :  { %v1226_v38 = vpack.c.bf16 %v421_v37, %v420_v36 }
  0x18   :  { %1134 = vmatmul.mubr.msk.f32.gmra.mrb[10].mxu0 %vm64_vm0, %v35_v15 }
  0x19   :  { %1136 = vmatprep.mubr.msk.f32.mxu0 %vm64_vm0, %v36_v16  ;;  %1227 = vmatprep.subr.bf16.mxu1 %v1226_v38 }
  0x1a   :  { %1229 = vmatpush3.bf16.msra.mxu1 %v1226_v38 }
  0x1c   :  { %1137 = vmatmul.mubr.msk.f32.gmra.mrb[12].mxu0 %vm64_vm0, %v37_v17 }
  0x1d   :  { %1139 = vmatprep.mubr.msk.f32.mxu0 %vm64_vm0, %v38_v18 }
  0x20   :  { %1140 = vmatmul.mubr.msk.f32.gmra.mrb[14].mxu0 %vm64_vm0, %v39_v19 }
  0x21   :  { %1142 = vmatprep.mubr.msk.f32.mxu0 %vm64_vm0, %v40_v20 }
  0x24   :  { %1143 = vmatmul.mubr.msk.f32.gmra.mrb[16].mxu0 %vm64_vm0, %v41_v21 }
  0x25   :  { %1145 = vmatprep.mubr.msk.f32.mxu0 %vm64_vm0, %v42_v22 }
  0x28   :  { %1146 = vmatmul.mubr.msk.f32.gmra.mrb[18].mxu0 %vm64_vm0, %v43_v23 }
  0x29   :  { %1148 = vmatprep.mubr.msk.f32.mxu0 %vm64_vm0, %v44_v24 }
  0x2c   :  { %1149 = vmatmul.mubr.msk.f32.gmra.mrb[20].mxu0 %vm64_vm0, %v45_v25 }
  0x2d   :  { %1151 = vmatprep.mubr.msk.f32.mxu0 %vm64_vm0, %v46_v26 }
  0x30   :  { %1152 = vmatmul.mubr.msk.f32.gmra.mrb[22].mxu0 %vm64_vm0, %v47_v27 }
  0x31   :  { %1154 = vmatprep.mubr.msk.f32.mxu0 %vm64_vm0, %v48_v28 }
  0x34   :  { %1155 = vmatmul.mubr.msk.f32.gmra.mrb[24].mxu0 %vm64_vm0, %v49_v29 }
  0x35   :  { %1157 = vmatprep.mubr.msk.f32.mxu0 %vm64_vm0, %v50_v30 }
  0x38   :  { %1158 = vmatmul.mubr.msk.f32.gmra.mrb[26].mxu0 %vm64_vm0, %v51_v31 }
  0x39   :  { %1160 = vmatprep.mubr.msk.f32.mxu0 %vm64_vm0, %v52_v32 }
  0x3c   :  { %1161 = vmatmul.mubr.msk.f32.gmra.mrb[28].mxu0 %vm64_vm0, %v53_v33 }
  0x3d   :  { %1163 = vmatprep.mubr.msk.f32.mxu0 %vm64_vm0, %v54_v34 }
  0x40   :  { %1164 = vmatmul.mubr.msk.f32.gmra.mrb[30].mxu0 %vm64_vm0, %v55_v35 }
  0xd7   :  { %v1120_v40 = vpop.f32.mrb[0].mxu0 }
  0xd8   :  { %v233_v41 = vadd.f32 %v1120_v40, %v1491_v39  ;;  %v227_v42 = vpop.f32.mrb[1].mxu0 }
  0xd9   :  { %v228_v43 = vadd.f32 %v1491_v39, %v227_v42 }
  0xda   :  { %v387_v46 = vmax.f32 %v233_v41, 0.0 }
  0xdb   :  { %v386_v44 = vmax.f32 %v228_v43, 0.0  ;;  %v1123_v45 = vpop.f32.mrb[2].mxu0 }
  0xdc   :  { %v243_v47 = vadd.f32 %v1123_v45, %v1491_v39  ;;  %v237_v48 = vpop.f32.mrb[3].mxu0 }
  0xdd   :  { %v238_v49 = vadd.f32 %v1491_v39, %v237_v48  ;;  %1174 = vmatprep.mubr.msk.f32.mxu1 %vm429_vm1, %v386_v44 }
  0xde   :  { %1175 = vmatmul.mubr.msk.f32.vlgmr.msra.gmra.mrb[0].mxu1 %vm429_vm1, %v387_v46  ;;  %v389_v52 = vmax.f32 %v243_v47, 0.0 }
  0xdf   :  { %v388_v50 = vmax.f32 %v238_v49, 0.0  ;;  %v1126_v51 = vpop.f32.mrb[4].mxu0 }
  0xe0   :  { %v253_v53 = vadd.f32 %v1126_v51, %v1491_v39  ;;  %v247_v54 = vpop.f32.mrb[5].mxu0 }
  0xe1   :  { %v248_v55 = vadd.f32 %v1491_v39, %v247_v54  ;;  %1177 = vmatprep.mubr.msk.f32.mxu1 %vm429_vm1, %v388_v50 }
  0xe2   :  { %1178 = vmatmul.mubr.msk.f32.gmra.mrb[2].mxu1 %vm429_vm1, %v389_v52  ;;  %v391_v58 = vmax.f32 %v253_v53, 0.0 }
  0xe3   :  { %v390_v56 = vmax.f32 %v248_v55, 0.0  ;;  %v1129_v57 = vpop.f32.mrb[6].mxu0 }
  0xe4   :  { %v263_v59 = vadd.f32 %v1129_v57, %v1491_v39  ;;  %v257_v60 = vpop.f32.mrb[7].mxu0 }
  0xe5   :  { %v258_v61 = vadd.f32 %v1491_v39, %v257_v60  ;;  %1180 = vmatprep.mubr.msk.f32.mxu1 %vm429_vm1, %v390_v56 }
  0xe6   :  { %1181 = vmatmul.mubr.msk.f32.gmra.mrb[4].mxu1 %vm429_vm1, %v391_v58  ;;  %v393_v0 = vmax.f32 %v263_v59, 0.0 }
  0xe7   :  { %v392_v62 = vmax.f32 %v258_v61, 0.0  ;;  %v1132_v63 = vpop.f32.mrb[8].mxu0 }
  0xe8   :  { %v273_v1 = vadd.f32 %v1132_v63, %v1491_v39  ;;  %v267_v2 = vpop.f32.mrb[9].mxu0 }
  0xe9   :  { %v268_v3 = vadd.f32 %v1491_v39, %v267_v2  ;;  %1183 = vmatprep.mubr.msk.f32.mxu1 %vm429_vm1, %v392_v62 }
  0xea   :  { %1184 = vmatmul.mubr.msk.f32.gmra.mrb[6].mxu1 %vm429_vm1, %v393_v0  ;;  %v395_v6 = vmax.f32 %v273_v1, 0.0 }
  0xeb   :  { %v394_v4 = vmax.f32 %v268_v3, 0.0  ;;  %v1135_v5 = vpop.f32.mrb[10].mxu0 }
  0xec   :  { %v283_v7 = vadd.f32 %v1135_v5, %v1491_v39  ;;  %v277_v8 = vpop.f32.mrb[11].mxu0 }
  0xed   :  { %v278_v9 = vadd.f32 %v1491_v39, %v277_v8  ;;  %1186 = vmatprep.mubr.msk.f32.mxu1 %vm429_vm1, %v394_v4 }
  0xee   :  { %1187 = vmatmul.mubr.msk.f32.gmra.mrb[8].mxu1 %vm429_vm1, %v395_v6  ;;  %v397_v12 = vmax.f32 %v283_v7, 0.0 }
  0xef   :  { %v396_v10 = vmax.f32 %v278_v9, 0.0  ;;  %v1138_v11 = vpop.f32.mrb[12].mxu0  ;;  %v1560_v9 = vld.sshfl [vmem:[%s1691_s5] sm:$0x33 pattern:$0x76325410] }
  0xf0   :  { %v293_v13 = vadd.f32 %v1138_v11, %v1491_v39  ;;  %v287_v14 = vpop.f32.mrb[13].mxu0 }
  0xf1   :  { %v288_v15 = vadd.f32 %v1491_v39, %v287_v14  ;;  %1189 = vmatprep.mubr.msk.f32.mxu1 %vm429_vm1, %v396_v10  ;;  %v856_v10 = vcombine.high %v1560_v9, %v1560_v9 }
  0xf2   :  { %1190 = vmatmul.mubr.msk.f32.gmra.mrb[10].mxu1 %vm429_vm1, %v397_v12  ;;  %v399_v18 = vmax.f32 %v293_v13, 0.0 }
  0xf3   :  { %v398_v16 = vmax.f32 %v288_v15, 0.0  ;;  %v1141_v17 = vpop.f32.mrb[14].mxu0  ;;  %923 = vmatprep.mubr.f32.mxu0 %v856_v10 }
  0xf4   :  { %v303_v19 = vadd.f32 %v1141_v17, %v1491_v39  ;;  %v297_v20 = vpop.f32.mrb[15].mxu0 }
  0xf5   :  { %v298_v21 = vadd.f32 %v1491_v39, %v297_v20  ;;  %1192 = vmatprep.mubr.msk.f32.mxu1 %vm429_vm1, %v398_v16 }
  0xf6   :  { %1193 = vmatmul.mubr.msk.f32.gmra.mrb[12].mxu1 %vm429_vm1, %v399_v18  ;;  %v401_v24 = vmax.f32 %v303_v19, 0.0 }
  0xf7   :  { %v400_v22 = vmax.f32 %v298_v21, 0.0  ;;  %v1144_v23 = vpop.f32.mrb[16].mxu0 }
  0xf8   :  { %v313_v25 = vadd.f32 %v1144_v23, %v1491_v39  ;;  %v307_v26 = vpop.f32.mrb[17].mxu0 }
  0xf9   :  { %v308_v27 = vadd.f32 %v1491_v39, %v307_v26  ;;  %1195 = vmatprep.mubr.msk.f32.mxu1 %vm429_vm1, %v400_v22 }
  0xfa   :  { %1196 = vmatmul.mubr.msk.f32.gmra.mrb[14].mxu1 %vm429_vm1, %v401_v24  ;;  %v403_v30 = vmax.f32 %v313_v25, 0.0 }
  0xfb   :  { %v402_v28 = vmax.f32 %v308_v27, 0.0  ;;  %v1147_v29 = vpop.f32.mrb[18].mxu0 }
  0xfc   :  { %v323_v31 = vadd.f32 %v1147_v29, %v1491_v39  ;;  %v317_v32 = vpop.f32.mrb[19].mxu0 }
  0xfd   :  { %v318_v33 = vadd.f32 %v1491_v39, %v317_v32  ;;  %1198 = vmatprep.mubr.msk.f32.mxu1 %vm429_vm1, %v402_v28 }
  0xfe   :  { %1199 = vmatmul.mubr.msk.f32.gmra.mrb[16].mxu1 %vm429_vm1, %v403_v30  ;;  %v405_v36 = vmax.f32 %v323_v31, 0.0 }
  0xff   :  { %v404_v34 = vmax.f32 %v318_v33, 0.0  ;;  %v1150_v35 = vpop.f32.mrb[20].mxu0 }
 0x100   :  { %v333_v37 = vadd.f32 %v1150_v35, %v1491_v39  ;;  %v327_v38 = vpop.f32.mrb[21].mxu0 }
 0x101   :  { %v328_v40 = vadd.f32 %v1491_v39, %v327_v38  ;;  %1201 = vmatprep.mubr.msk.f32.mxu1 %vm429_vm1, %v404_v34 }
 0x102   :  { %1202 = vmatmul.mubr.msk.f32.gmra.mrb[18].mxu1 %vm429_vm1, %v405_v36  ;;  %v407_v43 = vmax.f32 %v333_v37, 0.0 }
 0x103   :  { %v406_v41 = vmax.f32 %v328_v40, 0.0  ;;  %v1153_v42 = vpop.f32.mrb[22].mxu0 }
 0x104   :  { %v343_v44 = vadd.f32 %v1153_v42, %v1491_v39  ;;  %v337_v45 = vpop.f32.mrb[23].mxu0 }
 0x105   :  { %v338_v46 = vadd.f32 %v1491_v39, %v337_v45  ;;  %1204 = vmatprep.mubr.msk.f32.mxu1 %vm429_vm1, %v406_v41 }
 0x106   :  { %1205 = vmatmul.mubr.msk.f32.gmra.mrb[20].mxu1 %vm429_vm1, %v407_v43  ;;  %v409_v49 = vmax.f32 %v343_v44, 0.0 }
 0x107   :  { %v408_v47 = vmax.f32 %v338_v46, 0.0  ;;  %v1156_v48 = vpop.f32.mrb[24].mxu0 }
 0x108   :  { %v353_v50 = vadd.f32 %v1156_v48, %v1491_v39  ;;  %v347_v51 = vpop.f32.mrb[25].mxu0 }
 0x109   :  { %v348_v52 = vadd.f32 %v1491_v39, %v347_v51  ;;  %1207 = vmatprep.mubr.msk.f32.mxu1 %vm429_vm1, %v408_v47 }
 0x10a   :  { %1208 = vmatmul.mubr.msk.f32.gmra.mrb[22].mxu1 %vm429_vm1, %v409_v49  ;;  %v411_v55 = vmax.f32 %v353_v50, 0.0 }
 0x10b   :  { %v410_v53 = vmax.f32 %v348_v52, 0.0  ;;  %v1159_v54 = vpop.f32.mrb[26].mxu0 }
 0x10c   :  { %v363_v56 = vadd.f32 %v1159_v54, %v1491_v39  ;;  %v357_v57 = vpop.f32.mrb[27].mxu0 }
 0x10d   :  { %v358_v58 = vadd.f32 %v1491_v39, %v357_v57  ;;  %1210 = vmatprep.mubr.msk.f32.mxu1 %vm429_vm1, %v410_v53 }
 0x10e   :  { %1211 = vmatmul.mubr.msk.f32.gmra.mrb[24].mxu1 %vm429_vm1, %v411_v55  ;;  %v413_v61 = vmax.f32 %v363_v56, 0.0 }
 0x10f   :  { %v412_v59 = vmax.f32 %v358_v58, 0.0  ;;  %v1162_v60 = vpop.f32.mrb[28].mxu0 }
 0x110   :  { %v373_v62 = vadd.f32 %v1162_v60, %v1491_v39  ;;  %v367_v63 = vpop.f32.mrb[29].mxu0 }
 0x111   :  { %v368_v0 = vadd.f32 %v1491_v39, %v367_v63  ;;  %1213 = vmatprep.mubr.msk.f32.mxu1 %vm429_vm1, %v412_v59 }
 0x112   :  { %1214 = vmatmul.mubr.msk.f32.gmra.mrb[26].mxu1 %vm429_vm1, %v413_v61  ;;  %v415_v3 = vmax.f32 %v373_v62, 0.0 }
 0x113   :  { %v414_v1 = vmax.f32 %v368_v0, 0.0  ;;  %v1165_v2 = vpop.f32.mrb[30].mxu0 }
 0x114   :  { %v383_v4 = vadd.f32 %v1165_v2, %v1491_v39  ;;  %v377_v5 = vpop.f32.mrb[31].mxu0 }
 0x115   :  { %v378_v6 = vadd.f32 %v1491_v39, %v377_v5  ;;  %1216 = vmatprep.mubr.msk.f32.mxu1 %vm429_vm1, %v414_v1  ;;  %v1567_v39 = vld [vmem:[%s1690_s4] ss:$0 sm:$0xff]  ;;  %s1309_s4 = smov [#allocation2]  }
 0x116   :  { %1217 = vmatmul.mubr.msk.f32.gmra.mrb[28].mxu1 %vm429_vm1, %v415_v3  ;;  %v417_v8 = vmax.f32 %v383_v4, 0.0  ;;  %s937_s5 = sshll.u32 %s1309_s4, 4  ;;  %s938_s5 = int_to_ptr.vmem [resolvable:$true] %s937_s5 }
 0x117   :  { %v416_v7 = vmax.f32 %v378_v6, 0.0  ;;  %s1285_s23 = scalar_lea.vmem %s938_s5, 32  ;;  %p1290_p1 = scmp.lt.s32.totalorder %s938_s5, %s938_s5 }
 0x118   :  { %p1286_p0 = scmp.ne.s32.totalorder %s938_s5, %s1285_s23  ;;  %p1291_p2 = scmp.lt.s32.totalorder %s1285_s23, %s1285_s23 }
 0x119   :  { %1219 = vmatprep.mubr.msk.f32.mxu1 %vm429_vm1, %v416_v7 }
 0x11a   :  { %1220 = vmatmul.mubr.msk.f32.gmra.mrb[30].mxu1 %vm429_vm1, %v417_v8  ;;  %p1292_p3 = por %p1291_p2, %p1290_p1 }
 0x11c   :  { %p1293_p4 = pnand %p1292_p3, %p1286_p0 }
 0x1b1   :  { %v1176_v11 = vpop.f32.mrb[0].mxu1 }
 0x1b2   :  { %v598_v12 = vadd.f32 %v1176_v11, %v1567_v39  ;;  %v592_v13 = vpop.f32.mrb[1].mxu1 }
 0x1b3   :  { %v593_v14 = vadd.f32 %v1567_v39, %v592_v13 }
 0x1b4   :  { %v752_v15 = vmax.f32 %v598_v12, 1e-06 }
 0x1b5   :  { %v751_v16 = vmax.f32 %v593_v14, 1e-06  ;;  %v1179_v17 = vpop.f32.mrb[2].mxu1 }
 0x1b6   :  { %v784_v18 = vmul.f32 %v752_v15, %v752_v15  ;;  %v608_v19 = vadd.f32 %v1179_v17, %v1567_v39  ;;  %v602_v20 = vpop.f32.mrb[3].mxu1 }
 0x1b7   :  { %v783_v21 = vmul.f32 %v751_v16, %v751_v16  ;;  %v603_v22 = vadd.f32 %v1567_v39, %v602_v20 }
 0x1b8   :  { %v1573_v23 = vmul.f32 %v784_v18, %v752_v15  ;;  %v754_v24 = vmax.f32 %v608_v19, 1e-06 }
 0x1b9   :  { %v1575_v25 = vmul.f32 %v783_v21, %v751_v16  ;;  %v753_v26 = vmax.f32 %v603_v22, 1e-06  ;;  %v1182_v27 = vpop.f32.mrb[4].mxu1 }
 0x1ba   :  { %v786_v28 = vmul.f32 %v754_v24, %v754_v24  ;;  %v618_v29 = vadd.f32 %v1182_v27, %v1567_v39  ;;  %v612_v30 = vpop.f32.mrb[5].mxu1 }
 0x1bb   :  { %v1232_v31 = vpack.c.bf16 %v1573_v23, %v1575_v25  ;;  %v785_v32 = vmul.f32 %v753_v26, %v753_v26  ;;  %v613_v33 = vadd.f32 %v1567_v39, %v612_v30 }
 0x1bc   :  { %v1581_v34 = vmul.f32 %v786_v28, %v754_v24  ;;  %v756_v35 = vmax.f32 %v618_v29, 1e-06 }
 0x1bd   :  { %v1583_v36 = vmul.f32 %v785_v32, %v753_v26  ;;  %v755_v37 = vmax.f32 %v613_v33, 1e-06  ;;  %v1185_v38 = vpop.f32.mrb[6].mxu1 }
 0x1be   :  { %v788_v40 = vmul.f32 %v756_v35, %v756_v35  ;;  %v628_v41 = vadd.f32 %v1185_v38, %v1567_v39  ;;  %v622_v42 = vpop.f32.mrb[7].mxu1 }
 0x1bf   :  { %v1236_v43 = vpack.c.bf16 %v1581_v34, %v1583_v36  ;;  %v787_v44 = vmul.f32 %v755_v37, %v755_v37  ;;  %v623_v45 = vadd.f32 %v1567_v39, %v622_v42 }
 0x1c0   :  { %v1589_v46 = vmul.f32 %v788_v40, %v756_v35  ;;  %v758_v47 = vmax.f32 %v628_v41, 1e-06 }
 0x1c1   :  { %v1591_v48 = vmul.f32 %v787_v44, %v755_v37  ;;  %v757_v49 = vmax.f32 %v623_v45, 1e-06  ;;  %v1188_v50 = vpop.f32.mrb[8].mxu1 }
 0x1c2   :  { %v790_v51 = vmul.f32 %v758_v47, %v758_v47  ;;  %v638_v52 = vadd.f32 %v1188_v50, %v1567_v39  ;;  %v632_v53 = vpop.f32.mrb[9].mxu1 }
 0x1c3   :  { %v1240_v54 = vpack.c.bf16 %v1589_v46, %v1591_v48  ;;  %v789_v55 = vmul.f32 %v757_v49, %v757_v49  ;;  %v633_v56 = vadd.f32 %v1567_v39, %v632_v53 }
 0x1c4   :  { %v1597_v57 = vmul.f32 %v790_v51, %v758_v47  ;;  %v760_v58 = vmax.f32 %v638_v52, 1e-06 }
 0x1c5   :  { %v1599_v59 = vmul.f32 %v789_v55, %v757_v49  ;;  %v759_v60 = vmax.f32 %v633_v56, 1e-06  ;;  %v1191_v61 = vpop.f32.mrb[10].mxu1 }
 0x1c6   :  { %v792_v62 = vmul.f32 %v760_v58, %v760_v58  ;;  %v648_v63 = vadd.f32 %v1191_v61, %v1567_v39  ;;  %v642_v0 = vpop.f32.mrb[11].mxu1 }
 0x1c7   :  { %v1244_v1 = vpack.c.bf16 %v1597_v57, %v1599_v59  ;;  %v791_v2 = vmul.f32 %v759_v60, %v759_v60  ;;  %v643_v3 = vadd.f32 %v1567_v39, %v642_v0 }
 0x1c8   :  { %v1605_v4 = vmul.f32 %v792_v62, %v760_v58  ;;  %v762_v5 = vmax.f32 %v648_v63, 1e-06 }
 0x1c9   :  { %v1607_v6 = vmul.f32 %v791_v2, %v759_v60  ;;  %v761_v7 = vmax.f32 %v643_v3, 1e-06  ;;  %v1194_v8 = vpop.f32.mrb[12].mxu1 }
 0x1ca   :  { %v794_v10 = vmul.f32 %v762_v5, %v762_v5  ;;  %v658_v11 = vadd.f32 %v1194_v8, %v1567_v39  ;;  %v652_v12 = vpop.f32.mrb[13].mxu1 }
 0x1cb   :  { %v1248_v13 = vpack.c.bf16 %v1605_v4, %v1607_v6  ;;  %v793_v14 = vmul.f32 %v761_v7, %v761_v7  ;;  %v653_v15 = vadd.f32 %v1567_v39, %v652_v12 }
 0x1cc   :  { %v1613_v16 = vmul.f32 %v794_v10, %v762_v5  ;;  %v764_v17 = vmax.f32 %v658_v11, 1e-06 }
 0x1cd   :  { %v1615_v18 = vmul.f32 %v793_v14, %v761_v7  ;;  %v763_v19 = vmax.f32 %v653_v15, 1e-06  ;;  %v1197_v20 = vpop.f32.mrb[14].mxu1 }
 0x1ce   :  { %v796_v21 = vmul.f32 %v764_v17, %v764_v17  ;;  %v668_v22 = vadd.f32 %v1197_v20, %v1567_v39  ;;  %v662_v24 = vpop.f32.mrb[15].mxu1 }
 0x1cf   :  { %v1252_v26 = vpack.c.bf16 %v1613_v16, %v1615_v18  ;;  %v795_v27 = vmul.f32 %v763_v19, %v763_v19  ;;  %v663_v28 = vadd.f32 %v1567_v39, %v662_v24 }
 0x1d0   :  { %v1621_v29 = vmul.f32 %v796_v21, %v764_v17  ;;  %v766_v30 = vmax.f32 %v668_v22, 1e-06 }
 0x1d1   :  { %v1623_v32 = vmul.f32 %v795_v27, %v763_v19  ;;  %v765_v33 = vmax.f32 %v663_v28, 1e-06  ;;  %v1200_v35 = vpop.f32.mrb[16].mxu1 }
 0x1d2   :  { %v798_v37 = vmul.f32 %v766_v30, %v766_v30  ;;  %v678_v38 = vadd.f32 %v1200_v35, %v1567_v39  ;;  %v672_v40 = vpop.f32.mrb[17].mxu1 }
 0x1d3   :  { %v1256_v41 = vpack.c.bf16 %v1621_v29, %v1623_v32  ;;  %v797_v42 = vmul.f32 %v765_v33, %v765_v33  ;;  %v673_v44 = vadd.f32 %v1567_v39, %v672_v40 }
 0x1d4   :  { %v1629_v45 = vmul.f32 %v798_v37, %v766_v30  ;;  %v768_v47 = vmax.f32 %v678_v38, 1e-06 }
 0x1d5   :  { %v1631_v49 = vmul.f32 %v797_v42, %v765_v33  ;;  %v767_v50 = vmax.f32 %v673_v44, 1e-06  ;;  %v1203_v51 = vpop.f32.mrb[18].mxu1 }
 0x1d6   :  { %v800_v52 = vmul.f32 %v768_v47, %v768_v47  ;;  %v688_v53 = vadd.f32 %v1203_v51, %v1567_v39  ;;  %v682_v55 = vpop.f32.mrb[19].mxu1 }
 0x1d7   :  { %v1260_v56 = vpack.c.bf16 %v1629_v45, %v1631_v49  ;;  %v799_v58 = vmul.f32 %v767_v50, %v767_v50  ;;  %v683_v60 = vadd.f32 %v1567_v39, %v682_v55 }
 0x1d8   :  { %v832_v61 = vmul.f32 %v800_v52, %v768_v47  ;;  %v770_v62 = vmax.f32 %v688_v53, 1e-06 }
 0x1d9   :  { %v831_v63 = vmul.f32 %v799_v58, %v767_v50  ;;  %v769_v0 = vmax.f32 %v683_v60, 1e-06  ;;  %v1206_v2 = vpop.f32.mrb[20].mxu1 }
 0x1da   :  { %v802_v3 = vmul.f32 %v770_v62, %v770_v62  ;;  %v698_v5 = vadd.f32 %v1206_v2, %v1567_v39  ;;  %v692_v7 = vpop.f32.mrb[21].mxu1 }
 0x1db   :  { %v801_v8 = vmul.f32 %v769_v0, %v769_v0  ;;  %v693_v10 = vadd.f32 %v1567_v39, %v692_v7  ;;  %v1230_v11 = vpack.c.bf16 %v832_v61, %v831_v63 }
 0x1dc   :  { %v834_v12 = vmul.f32 %v802_v3, %v770_v62  ;;  %v772_v14 = vmax.f32 %v698_v5, 1e-06 }
 0x1dd   :  { %v833_v15 = vmul.f32 %v801_v8, %v769_v0  ;;  %v771_v17 = vmax.f32 %v693_v10, 1e-06  ;;  %v1209_v19 = vpop.f32.mrb[22].mxu1  ;;  %1231 = vmatprep.subr.bf16.mxu0 %v1230_v11 }
 0x1de   :  { %v804_v20 = vmul.f32 %v772_v14, %v772_v14  ;;  %v708_v21 = vadd.f32 %v1209_v19, %v1567_v39  ;;  %v702_v22 = vpop.f32.mrb[23].mxu1  ;;  %1233 = vmatpush3.bf16.msra.mxu0 %v1232_v31 }
 0x1df   :  { %v803_v24 = vmul.f32 %v771_v17, %v771_v17  ;;  %v703_v27 = vadd.f32 %v1567_v39, %v702_v22  ;;  %v1234_v28 = vpack.c.bf16 %v834_v12, %v833_v15 }
 0x1e0   :  { %v836_v30 = vmul.f32 %v804_v20, %v772_v14  ;;  %v774_v33 = vmax.f32 %v708_v21, 1e-06 }
 0x1e1   :  { %v835_v35 = vmul.f32 %v803_v24, %v771_v17  ;;  %v773_v37 = vmax.f32 %v703_v27, 1e-06  ;;  %v1212_v38 = vpop.f32.mrb[24].mxu1  ;;  %1235 = vmatprep.subr.bf16.mxu0 %v1234_v28 }
 0x1e2   :  { %v806_v40 = vmul.f32 %v774_v33, %v774_v33  ;;  %v718_v42 = vadd.f32 %v1212_v38, %v1567_v39  ;;  %v712_v44 = vpop.f32.mrb[25].mxu1  ;;  %1237 = vmatpush3.bf16.msra.mxu0 %v1236_v43 }
 0x1e3   :  { %v805_v23 = vmul.f32 %v773_v37, %v773_v37  ;;  %v713_v25 = vadd.f32 %v1567_v39, %v712_v44  ;;  %v1238_v31 = vpack.c.bf16 %v836_v30, %v835_v35 }
 0x1e4   :  { %v838_v47 = vmul.f32 %v806_v40, %v774_v33  ;;  %v776_v50 = vmax.f32 %v718_v42, 1e-06 }
 0x1e5   :  { %v837_v51 = vmul.f32 %v805_v23, %v773_v37  ;;  %v775_v52 = vmax.f32 %v713_v25, 1e-06  ;;  %v1215_v53 = vpop.f32.mrb[26].mxu1  ;;  %1239 = vmatprep.subr.bf16.mxu0 %v1238_v31 }
 0x1e6   :  { %v808_v55 = vmul.f32 %v776_v50, %v776_v50  ;;  %v728_v58 = vadd.f32 %v1215_v53, %v1567_v39  ;;  %v722_v60 = vpop.f32.mrb[27].mxu1  ;;  %1241 = vmatpush3.bf16.msra.mxu0 %v1240_v54 }
 0x1e7   :  { %v807_v34 = vmul.f32 %v775_v52, %v775_v52  ;;  %v723_v36 = vadd.f32 %v1567_v39, %v722_v60  ;;  %v1242_v43 = vpack.c.bf16 %v838_v47, %v837_v51 }
 0x1e8   :  { %v840_v61 = vmul.f32 %v808_v55, %v776_v50  ;;  %v778_v62 = vmax.f32 %v728_v58, 1e-06 }
 0x1e9   :  { %v839_v63 = vmul.f32 %v807_v34, %v775_v52  ;;  %v777_v0 = vmax.f32 %v723_v36, 1e-06  ;;  %v1218_v2 = vpop.f32.mrb[28].mxu1  ;;  %1243 = vmatprep.subr.bf16.mxu0 %v1242_v43 }
 0x1ea   :  { %v810_v3 = vmul.f32 %v778_v62, %v778_v62  ;;  %v738_v5 = vadd.f32 %v1218_v2, %v1567_v39  ;;  %v732_v7 = vpop.f32.mrb[29].mxu1  ;;  %1245 = vmatpush3.bf16.msra.mxu0 %v1244_v1 }
 0x1eb   :  { %v809_v46 = vmul.f32 %v777_v0, %v777_v0  ;;  %v733_v48 = vadd.f32 %v1567_v39, %v732_v7  ;;  %v1246_v54 = vpack.c.bf16 %v840_v61, %v839_v63 }
 0x1ec   :  { %v842_v8 = vmul.f32 %v810_v3, %v778_v62  ;;  %v780_v10 = vmax.f32 %v738_v5, 1e-06 }
 0x1ed   :  { %v841_v11 = vmul.f32 %v809_v46, %v777_v0  ;;  %v779_v12 = vmax.f32 %v733_v48, 1e-06  ;;  %v1221_v14 = vpop.f32.mrb[30].mxu1  ;;  %1247 = vmatprep.subr.bf16.mxu0 %v1246_v54 }
 0x1ee   :  { %v812_v15 = vmul.f32 %v780_v10, %v780_v10  ;;  %v748_v17 = vadd.f32 %v1221_v14, %v1567_v39  ;;  %v742_v19 = vpop.f32.mrb[31].mxu1  ;;  %1249 = vmatpush3.bf16.msra.mxu0 %v1248_v13 }
 0x1ef   :  { %v811_v57 = vmul.f32 %v779_v12, %v779_v12  ;;  %v743_v59 = vadd.f32 %v1567_v39, %v742_v19  ;;  %v1250_v1 = vpack.c.bf16 %v842_v8, %v841_v11 }
 0x1f0   :  { %v844_v20 = vmul.f32 %v812_v15, %v780_v10  ;;  %v782_v21 = vmax.f32 %v748_v17, 1e-06 }
 0x1f1   :  { %v843_v22 = vmul.f32 %v811_v57, %v779_v12  ;;  %v781_v24 = vmax.f32 %v743_v59, 1e-06  ;;  %1251 = vmatprep.subr.bf16.mxu0 %v1250_v1 }
 0x1f2   :  { %v814_v27 = vmul.f32 %v782_v21, %v782_v21  ;;  %1253 = vmatpush3.bf16.msra.mxu0 %v1252_v26 }
 0x1f3   :  { %v813_v28 = vmul.f32 %v781_v24, %v781_v24  ;;  %v1254_v30 = vpack.c.bf16 %v844_v20, %v843_v22 }
 0x1f4   :  { %v846_v33 = vmul.f32 %v814_v27, %v782_v21 }
 0x1f5   :  { %v845_v35 = vmul.f32 %v813_v28, %v781_v24  ;;  %1255 = vmatprep.subr.bf16.mxu0 %v1254_v30 }
 0x1f6   :  { %1257 = vmatpush3.bf16.msra.mxu0 %v1256_v41 }
 0x1f7   :  { %v1258_v39 = vpack.c.bf16 %v846_v33, %v845_v35 }
 0x1f9   :  { %1259 = vmatprep.subr.bf16.mxu0 %v1258_v39 }
 0x1fa   :  { %1261 = vmatpush3.bf16.msra.mxu0 %v1260_v56 }
 0x1fd   :  { %924 = vmatmul.mubr.f32.vlgmr.msra.gmra.mrb[32].mxu0 %v1560_v9 }
 0x2d0   :  { %v1113_v4 = vpop.f32.mrb[32].mxu0 }
 0x2d1   :  { %v1114_v6 = vpop.f32.mrb[33].mxu0 }
 0x2d2   :  { %v1115_v13 = vadd.f32 %v1114_v6, %v1113_v4 }
 0x2d4   :  { %v1264_v16 = vand.u32 2147483647, %v1115_v13  ;;  %v1268_v37 = vand.u32 2147483648, %v1115_v13  ;;  %vm1263_vm4 = vcmp.lt.f32.partialorder %v1115_v13, 0.0  ;;  %vm1262_vm5 = vcmp.eq.f32.partialorder %v1115_v13, 0.0 }
 0x2d6   :  { %1281 = vlog2.f32 %v1264_v16  ;;  %vm1272_vm2 = vweird.f32 %v1264_v16  ;;  %vm1274_vm3 = vcmp.eq.f32.partialorder %v1264_v16, 0.0  ;;  %vm1265_vm6 = vcmp.eq.f32.partialorder %v1264_v16, inf }
 0x2e0   :  { %v1282_v18 = vpop.eup %1281 }
 0x2e1   :  { %v1269_v26 = vmul.f32 0.33333334, %v1282_v18 }
 0x2e3   :  { %1283 = vpow2.f32 %v1269_v26 }
 0x2ed   :  { %v1284_v38 = vpop.eup %1283 }
 0x2ee   :  { %v1271_v29 = vor.u32 %v1284_v38, %v1268_v37 }
 0x2f0   :  { %v1273_v32 = vsel %vm1272_vm2, %v1115_v13, %v1271_v29 }
 0x2f1   :  { %v1276_v41 = vsel %vm1274_vm3, %v1268_v37, %v1273_v32 }
 0x2f2   :  { %v1277_v9 = vsel %vm1263_vm4, nan, %v1276_v41 }
 0x2f3   :  { %v1278_v45 = vsel %vm1262_vm5, 0.0, %v1277_v9 }
 0x2f4   :  { %v1279_v49 = vsel %vm1265_vm6, inf, %v1278_v45 }
 0x2f5   :  { %930 = vst [vmem:[#allocation2] sm:$0x3] %v1279_v49 }
 0x2f6   :  { %1296 = shalt.err (!%p1293_p4)
}
 0x2f7   :  { %s1297_s26 = scalar_lea.hbm %s1692_s6, 32 }
 0x2f8   :  { %p1298_p5 = scmp.ne.s32.totalorder %s1692_s6, %s1297_s26  ;;  %p1301_p6 = scmp.lt.u32.totalorder %s1297_s26, %s1692_s6 }
 0x2fa   :  { %p1303_p7 = pnand %p1301_p6, %p1298_p5 }
 0x2fc   :  { %1306 = shalt.err (!%p1303_p7)
}
 0x2fd   :  { %940 = dma.vmem_to_hbm [thread:$0]  %s938_s5, 32, %s1692_s6, [#allocation3]  }
 0x2fe   :  { %1307 = dma.done.wait [#allocation3], 32  }
 0x2ff   :  { %1308 = vsyncadd [#allocation3], 4294967264 }
 0x300   :  { %944 = vsyncpa [#allocation3], 1 }

</bundles_post_ra>
